<compile_context>
chip_gen: v7x
topology: tpu7x:2x2x1
jax: 0.10.0
libtpu: 0.0.40
codegen_flags: <defaults>
</compile_context>

<pallas_src>
import functools

import jax
import jax.numpy as jnp
from jax import lax
from jax.experimental import pallas as pl
from jax.experimental.pallas import tpu as pltpu

_TL = 256  # inner sub-chunk lane width (multiple of 128)


def _tpu_generation():
    """Best-effort TPU generation (5, 6, 7, ...) from device_kind; None if unknown."""
    try:
        kind = jax.devices()[0].device_kind.lower()
    except Exception:
        return None
    if "tpu" not in kind:
        return None
    for g in (7, 6, 5, 4, 3):
        if str(g) in kind:
            return g
    return None


def _soft_hist_kernel(x_ref, c_ref, o_ref, acc_ref, cp_ref, cm_ref, *,
                      sigma, delta, nsub, unroll, bf16_eup):
    # x_ref:   (1, tn)      chunk of samples on lanes, tn = nsub * _TL
    # c_ref:   (bins, 1)    bin centers on sublanes (resident)
    # o_ref:   (bins, 1)    per-bin soft counts for this split
    # acc_ref: (bins, _TL)  lane-dense f32 accumulator, persists across steps
    # cp_ref:  (bins, _TL)  broadcast of 0.5*sigma*c - 0.25*sigma*delta (VMEM)
    # cm_ref:  (bins, _TL)  broadcast of 0.5*sigma*c + 0.25*sigma*delta (VMEM)
    bins = acc_ref.shape[0]
    step = pl.program_id(1)

    # sigmoid(s*(d+delta/2)) - sigmoid(s*(d-delta/2))
    #   = 0.5*(tanh(xs - cp) - tanh(xs - cm))
    # with xs = 0.5*sigma*x, cp = 0.5*sigma*c - 0.25*sigma*delta,
    #                        cm = 0.5*sigma*c + 0.25*sigma*delta.
    half_sigma = 0.5 * sigma
    off = 0.25 * sigma * delta

    @pl.when(step == 0)
    def _():
        acc_ref[...] = jnp.zeros_like(acc_ref)
        # Fill the constant broadcasts ONCE; the inner loop streams them from
        # VMEM instead of pinning 32 vregs of broadcast values.
        cs = c_ref[...] * half_sigma                      # (bins, 1)
        cp_ref[...] = jnp.broadcast_to(cs - off, (bins, _TL))
        cm_ref[...] = jnp.broadcast_to(cs + off, (bins, _TL))

    def body(j, carry):
        start = pl.multiple_of(j * _TL, _TL)
        xs = x_ref[:, pl.ds(start, _TL)] * half_sigma     # (1, _TL)
        u1 = xs - cp_ref[...]                             # (bins, _TL) f32
        u2 = xs - cm_ref[...]                             # (bins, _TL) f32
        if bf16_eup:
            # v6e/v7x only: bf16 transcendentals halve the binding EUP slot.
            # Differences feeding tanh and the accumulation stay f32.
            t1 = jnp.tanh(u1.astype(jnp.bfloat16)).astype(jnp.float32)
            t2 = jnp.tanh(u2.astype(jnp.bfloat16)).astype(jnp.float32)
        else:
            t1 = jnp.tanh(u1)
            t2 = jnp.tanh(u2)
        acc_ref[...] += t1 - t2
        return carry

    lax.fori_loop(0, nsub, body, 0, unroll=unroll)

    @pl.when(step == pl.num_programs(1) - 1)
    def _():
        o_ref[...] = (0.5 * jnp.sum(acc_ref[...], axis=-1, keepdims=True)
                      ).astype(o_ref.dtype)


def soft_histogram(x, centers, *, sigma, delta, tn=16384, num_splits=None,
                   precision="f32"):
    """x: (N,) float, centers: (bins,) float -> (bins,) float32 soft histogram.

    precision: "f32" (exact module semantics) or "bf16" (bf16 transcendentals,
    f32 accumulation; only meaningful/advisable on v6e/v7x).
    """
    sigma = float(sigma)
    delta = float(delta)
    N = int(x.shape[0])
    bins = int(centers.shape[0])

    gen = _tpu_generation()
    if num_splits is None:
        # v7x has 2 TensorCores/chip -> split the reduction; single-TC chips
        # (v5e/v6e) get no benefit, only extra grid steps and padding.
        num_splits = 2 if (gen is not None and gen >= 7) else 1
    num_splits = max(1, int(num_splits))

    # Tile sizing: tn is a multiple of the inner sub-chunk width; clamp it to
    # (roughly) the per-split work so small inputs pay the fixed per-step cost
    # only once and don't pad excessively.
    tn = max(_TL, (int(tn) // _TL) * _TL)
    per_split = -(-N // num_splits)                       # ceil(N / num_splits)
    tn = min(tn, max(_TL, -(-per_split // _TL) * _TL))    # round up to _TL
    unit = tn * num_splits
    n_pad = -(-N // unit) * unit                          # round up to a multiple
    steps_per_split = n_pad // unit
    nsub = tn // _TL
    unroll = max(1, min(4, nsub))                         # small unroll, not full

    x = x.astype(jnp.float32)
    if n_pad != N:
        # Pad value sits far below every center: both tanh terms saturate to -1
        # and padded samples contribute exactly 0 (holds in bf16 as well).
        pad_val = jnp.min(centers).astype(jnp.float32) - jnp.float32(
            delta + 100.0 / max(sigma, 1e-6))
        x = jnp.concatenate(
            [x, jnp.full((n_pad - N,), pad_val, dtype=jnp.float32)])

    x2 = x.reshape(1, n_pad)
    c2 = centers.reshape(bins, 1).astype(jnp.float32)

    kernel = functools.partial(
        _soft_hist_kernel, sigma=sigma, delta=delta, nsub=nsub, unroll=unroll,
        bf16_eup=(precision == "bf16"))

    # Advisory cost hint for XLA scheduling around the custom call.
    cost = pl.CostEstimate(
        flops=6 * bins * n_pad,
        transcendentals=2 * bins * n_pad,
        bytes_accessed=4 * (n_pad + bins + num_splits * bins),
    )

    spt = steps_per_split
    out = pl.pallas_call(
        kernel,
        out_shape=jax.ShapeDtypeStruct((num_splits, bins, 1), jnp.float32),
        grid_spec=pltpu.PrefetchScalarGridSpec(
            num_scalar_prefetch=0,
            grid=(num_splits, steps_per_split),
            in_specs=[
                # sample chunk: split s handles steps [s*spt, (s+1)*spt)
                pl.BlockSpec((1, tn), lambda s, i: (0, s * spt + i)),
                # centers, resident across the whole grid
                pl.BlockSpec((bins, 1), lambda s, i: (0, 0)),
            ],
            out_specs=pl.BlockSpec((None, bins, 1), lambda s, i: (s, 0, 0)),
            scratch_shapes=[
                pltpu.VMEM((bins, _TL), jnp.float32),   # accumulator
                pltpu.VMEM((bins, _TL), jnp.float32),   # cp broadcast ('+delta/2')
                pltpu.VMEM((bins, _TL), jnp.float32),   # cm broadcast ('-delta/2')
            ],
        ),
        # Note: on v7x, if "parallel" on the split axis does not shard across
        # the two TensorCores, switch it to pltpu.CORE_PARALLEL.
        compiler_params=pltpu.CompilerParams(
            dimension_semantics=("parallel", "arbitrary")),
        cost_estimate=cost,
    )(x2, c2)
    # Sum the per-split partial histograms.
    return out.sum(axis=0).reshape(bins)


def soft_histogram_reference(x, centers, *, sigma, delta):
    diff = x[None, :] - centers[:, None]
    y = (jax.nn.sigmoid(sigma * (diff + delta / 2.0))
         - jax.nn.sigmoid(sigma * (diff - delta / 2.0)))
    return y.sum(axis=1)


if __name__ == "__main__":
    # Module hyperparameters (deterministic, set in-script).
    bins = 64
    vmin, vmax = 0.0, 1.0
    sigma = 25.0
    delta = float(vmax - vmin) / float(bins)
    centers = vmin + delta * (jnp.arange(bins, dtype=jnp.float32) + 0.5)

    key = jax.random.PRNGKey(0)
    k1, k2 = jax.random.split(key)

    # Small demo input: flat vector of N samples (single grid step path).
    N = 256
    x = jax.random.uniform(k1, (N,), dtype=jnp.float32, minval=vmin, maxval=vmax)
    out = soft_histogram(x, centers, sigma=sigma, delta=delta)
    out = jax.block_until_ready(out)
    ref = soft_histogram_reference(x, centers, sigma=sigma, delta=delta)
    assert out.shape == (bins,)
    assert jnp.allclose(out, ref, atol=1e-4, rtol=1e-4)

    # Exercise the padded / multi-step / multi-split path as well
    # (N not a multiple of the tile; num_splits=2 mimics the v7x 2-TC split).
    N2 = 5000
    x2 = jax.random.uniform(k2, (N2,), dtype=jnp.float32, minval=vmin, maxval=vmax)
    out2 = soft_histogram(x2, centers, sigma=sigma, delta=delta,
                          tn=2048, num_splits=2)
    out2 = jax.block_until_ready(out2)
    ref2 = soft_histogram_reference(x2, centers, sigma=sigma, delta=delta)
    assert jnp.allclose(out2, ref2, atol=1e-4, rtol=1e-4)

    # bf16-EUP path (v6e/v7x only): ~2x on the binding EUP slot, looser
    # per-element accuracy (~1e-2 relative); accumulation stays f32.
    gen = _tpu_generation()
    if gen is not None and gen >= 6:
        out3 = soft_histogram(x2, centers, sigma=sigma, delta=delta,
                              precision="bf16")
        out3 = jax.block_until_ready(out3)
        tol = 0.05 * float(jnp.max(jnp.abs(ref2))) + 0.05
        assert jnp.allclose(out3, ref2, rtol=0.05, atol=tol)

    print("KERNEL_OK")
</pallas_src>

<mosaic_0001>
module attributes {stable_mosaic.version = 11 : i64} {
  func.func @_soft_hist_kernel(%arg0: i32, %arg1: i32, %arg2: memref<1x256xf32, #tpu.memory_space<vmem>>, %arg3: memref<64x1xf32, #tpu.memory_space<vmem>>, %arg4: memref<1x64x1xf32, #tpu.memory_space<vmem>>, %arg5: memref<64x256xf32, #tpu.memory_space<vmem>>, %arg6: memref<64x256xf32, #tpu.memory_space<vmem>>, %arg7: memref<64x256xf32, #tpu.memory_space<vmem>>) attributes {dimension_semantics = [#tpu.dimension_semantics<parallel>, #tpu.dimension_semantics<arbitrary>], iteration_bounds = array<i64: 1, 1>, scalar_prefetch = 0 : i64, scratch_operands = 3 : i64, tpu.core_type = #tpu.core_type<tc>, window_params = [{transform_indices = @transform_0, window_bounds = array<i64: 1, 256>}, {pipeline_mode = #tpu.pipeline_mode<synchronous>, transform_indices = @transform_1, window_bounds = array<i64: 64, 1>}, {transform_indices = @transform_2, window_bounds = array<i64: 1, 64, 1>}]} {
    %c0_i32 = arith.constant 0 : i32
    %0 = arith.cmpi eq, %arg1, %c0_i32 : i32
    %1 = arith.extui %0 : i1 to i32
    %c0_i32_0 = arith.constant 0 : i32
    %2 = arith.cmpi ne, %1, %c0_i32_0 : i32
    scf.if %2 {
      %cst_12 = arith.constant 0.000000e+00 : f32
      %24 = vector.broadcast %cst_12 : f32 to vector<64x256xf32>
      %c0_13 = arith.constant 0 : index
      %c0_14 = arith.constant 0 : index
      %25 = vector.load %arg5[%c0_13, %c0_14] : memref<64x256xf32, #tpu.memory_space<vmem>>, vector<64x256xf32>
      tpu.vector_store %arg5[%c0_13, %c0_14], %24 {strides = array<i32>} : memref<64x256xf32, #tpu.memory_space<vmem>>, vector<64x256xf32>,
      %c0_15 = arith.constant 0 : index
      %c0_16 = arith.constant 0 : index
      %26 = vector.load %arg3[%c0_15, %c0_16] : memref<64x1xf32, #tpu.memory_space<vmem>>, vector<64x1xf32>
      %cst_17 = arith.constant 1.250000e+01 : f32
      %27 = vector.broadcast %cst_17 : f32 to vector<64x1xf32>
      %28 = arith.mulf %26, %27 : vector<64x1xf32>
      %cst_18 = arith.constant 0.09765625 : f32
      %29 = vector.broadcast %cst_18 : f32 to vector<64x1xf32>
      %30 = arith.subf %28, %29 : vector<64x1xf32>
      %31 = vector.shape_cast %30 : vector<64x1xf32> to vector<64x1xf32>
      %32 = vector.broadcast %31 : vector<64x1xf32> to vector<64x256xf32>
      %c0_19 = arith.constant 0 : index
      %c0_20 = arith.constant 0 : index
      %33 = vector.load %arg6[%c0_19, %c0_20] : memref<64x256xf32, #tpu.memory_space<vmem>>, vector<64x256xf32>
      tpu.vector_store %arg6[%c0_19, %c0_20], %32 {strides = array<i32>} : memref<64x256xf32, #tpu.memory_space<vmem>>, vector<64x256xf32>,
      %cst_21 = arith.constant 0.09765625 : f32
      %34 = vector.broadcast %cst_21 : f32 to vector<64x1xf32>
      %35 = arith.addf %28, %34 : vector<64x1xf32>
      %36 = vector.shape_cast %35 : vector<64x1xf32> to vector<64x1xf32>
      %37 = vector.broadcast %36 : vector<64x1xf32> to vector<64x256xf32>
      %c0_22 = arith.constant 0 : index
      %c0_23 = arith.constant 0 : index
      %38 = vector.load %arg7[%c0_22, %c0_23] : memref<64x256xf32, #tpu.memory_space<vmem>>, vector<64x256xf32>
      tpu.vector_store %arg7[%c0_22, %c0_23], %37 {strides = array<i32>} : memref<64x256xf32, #tpu.memory_space<vmem>>, vector<64x256xf32>,
    } else {
    }
    %c0_i32_1 = arith.constant 0 : i32
    %c256_i32 = arith.constant 256 : i32
    %3 = arith.muli %c0_i32_1, %c256_i32 : i32
    %4 = tpu.assume_multiple %3, 256 : i32
    %c0 = arith.constant 0 : index
    %5 = arith.index_cast %4 : i32 to index
    %6 = vector.load %arg2[%c0, %5] : memref<1x256xf32, #tpu.memory_space<vmem>>, vector<1x256xf32>
    %cst = arith.constant 1.250000e+01 : f32
    %7 = vector.broadcast %cst : f32 to vector<1x256xf32>
    %8 = arith.mulf %6, %7 : vector<1x256xf32>
    %c0_2 = arith.constant 0 : index
    %c0_3 = arith.constant 0 : index
    %9 = vector.load %arg6[%c0_2, %c0_3] : memref<64x256xf32, #tpu.memory_space<vmem>>, vector<64x256xf32>
    %10 = vector.broadcast %8 : vector<1x256xf32> to vector<64x256xf32>
    %11 = arith.subf %10, %9 : vector<64x256xf32>
    %c0_4 = arith.constant 0 : index
    %c0_5 = arith.constant 0 : index
    %12 = vector.load %arg7[%c0_4, %c0_5] : memref<64x256xf32, #tpu.memory_space<vmem>>, vector<64x256xf32>
    %13 = vector.broadcast %8 : vector<1x256xf32> to vector<64x256xf32>
    %14 = arith.subf %13, %12 : vector<64x256xf32>
    %15 = math.tanh %11 : vector<64x256xf32>
    %16 = math.tanh %14 : vector<64x256xf32>
    %c0_6 = arith.constant 0 : index
    %c0_7 = arith.constant 0 : index
    %17 = vector.load %arg5[%c0_6, %c0_7] : memref<64x256xf32, #tpu.memory_space<vmem>>, vector<64x256xf32>
    %18 = arith.subf %15, %16 : vector<64x256xf32>
    %19 = arith.addf %17, %18 : vector<64x256xf32>
    %c0_8 = arith.constant 0 : index
    %c0_9 = arith.constant 0 : index
    %20 = vector.load %arg5[%c0_8, %c0_9] : memref<64x256xf32, #tpu.memory_space<vmem>>, vector<64x256xf32>
    tpu.vector_store %arg5[%c0_8, %c0_9], %19 {strides = array<i32>} : memref<64x256xf32, #tpu.memory_space<vmem>>, vector<64x256xf32>,
    %c1_i32 = arith.constant 1 : i32
    %c0_i32_10 = arith.constant 0 : i32
    %21 = arith.cmpi eq, %arg1, %c0_i32_10 : i32
    %22 = arith.extui %21 : i1 to i32
    %c0_i32_11 = arith.constant 0 : i32
    %23 = arith.cmpi ne, %22, %c0_i32_11 : i32
    scf.if %23 {
      %c0_12 = arith.constant 0 : index
      %c0_13 = arith.constant 0 : index
      %24 = vector.load %arg5[%c0_12, %c0_13] : memref<64x256xf32, #tpu.memory_space<vmem>>, vector<64x256xf32>
      %cst_14 = arith.constant dense<0.000000e+00> : vector<64xf32>
      %25 = vector.multi_reduction <add>, %24, %cst_14 [1] : vector<64x256xf32> to vector<64xf32>
      %26 = vector.shape_cast %25 : vector<64xf32> to vector<64x1xf32>
      %cst_15 = arith.constant 5.000000e-01 : f32
      %27 = vector.broadcast %cst_15 : f32 to vector<64x1xf32>
      %28 = arith.mulf %27, %26 : vector<64x1xf32>
      %c0_16 = arith.constant 0 : index
      %c0_17 = arith.constant 0 : index
      %c0_18 = arith.constant 0 : index
      %29 = vector.load %arg4[%c0_16, %c0_17, %c0_18] : memref<1x64x1xf32, #tpu.memory_space<vmem>>, vector<1x64x1xf32>
      %30 = vector.shape_cast %29 : vector<1x64x1xf32> to vector<64x1xf32>
      %31 = vector.shape_cast %28 : vector<64x1xf32> to vector<1x64x1xf32>
      tpu.vector_store %arg4[%c0_16, %c0_17, %c0_18], %31 {strides = array<i32>} : memref<1x64x1xf32, #tpu.memory_space<vmem>>, vector<1x64x1xf32>,
    } else {
    }
    return
  }
  func.func @transform_0(%arg0: i32, %arg1: i32) -> (i32, i32) {
    %c1_i32 = arith.constant 1 : i32
    %0 = arith.muli %arg0, %c1_i32 : i32
    %1 = arith.addi %0, %arg1 : i32
    %c0_i32 = arith.constant 0 : i32
    %c0_i32_0 = arith.constant 0 : i32
    return %c0_i32, %1 : i32, i32
  }
  func.func @transform_1(%arg0: i32, %arg1: i32) -> (i32, i32) {
    %c0_i32 = arith.constant 0 : i32
    %c0_i32_0 = arith.constant 0 : i32
    %c0_i32_1 = arith.constant 0 : i32
    return %c0_i32, %c0_i32_0 : i32, i32
  }
  func.func @transform_2(%arg0: i32, %arg1: i32) -> (i32, i32, i32) {
    %c0_i32 = arith.constant 0 : i32
    %c0_i32_0 = arith.constant 0 : i32
    %c0_i32_1 = arith.constant 0 : i32
    return %arg0, %c0_i32, %c0_i32_0 : i32, i32, i32
  }
}

</mosaic_0001>

<bundles_post_ra>
// kernel: tpu_custom_call.1
= control target key start
LH: loop header
LB: loop body
LE: loop exit
PB: predicated region body
PF: predicated region fallthrough
CT: control target
= control target key end

     0   :  { %v509_v0 = vmov 0   ;;  %v213_v33 = vlaneseq  ;;  %vm418_vm0 = vcmask 7168   ;;  %s651_s1 = inlined_call_operand.vmem [shape: f32[64,1], index: 1, kind: input, shape index: {}]   ;;  %s652_s0 = inlined_call_operand.vmem [shape: f32[1,256], index: 0, kind: input, shape index: {}]   ;;  %s653_s2 = inlined_call_operand.vmem [shape: f32[1,64,1], index: 2, kind: output, shape index: {}]  }
   0x1   :  { %444 = vset.pattern.permute.xlu1 %v509_v0  ;;  %443 = vset.pattern.permute.xlu0 %v509_v0  ;;  %v52_v1 = vld [vmem:[%s651_s1 + $0x10] sm:$0xff]  ;;  %v50_v2 = vld [vmem:[%s651_s1] sm:$0xff]  ;;  %v53_v3 = vld [vmem:[%s651_s1 + $0x18] sm:$0xff] }
   0x2   :  { %v60_v4 = vmul.f32 12.5, %v52_v1  ;;  %v58_v5 = vmul.f32 12.5, %v50_v2  ;;  %v61_v6 = vmul.f32 12.5, %v53_v3  ;;  %v51_v7 = vld [vmem:[%s651_s1 + $0x8] sm:$0xff]  ;;  %v54_v10 = vld [vmem:[%s651_s1 + $0x20] sm:$0xff]  ;;  %v57_v17 = vld [vmem:[%s651_s1 + $0x38] sm:$0xff] }
   0x3   :  { %v59_v8 = vmul.f32 12.5, %v51_v7  ;;  %v55_v9 = vld [vmem:[%s651_s1 + $0x28] sm:$0xff]  ;;  %v62_v16 = vmul.f32 12.5, %v54_v10  ;;  %v56_v18 = vld [vmem:[%s651_s1 + $0x30] sm:$0xff]  ;;  %v65_v21 = vmul.f32 12.5, %v57_v17  ;;  %v214_v34 = vshrl.u32 %v213_v33, 7 }
   0x4   :  { %v436_v11 = vadd.f32 -0.09765625, %v60_v4  ;;  %v434_v12 = vadd.f32 -0.09765625, %v58_v5  ;;  %v437_v13 = vadd.f32 -0.09765625, %v61_v6  ;;  %v63_v15 = vmul.f32 12.5, %v55_v9  ;;  %v194_v35 = vld [vmem:[%s652_s0] sm:$0x3] }
   0x5   :  { %v435_v14 = vadd.f32 -0.09765625, %v59_v8  ;;  %v438_v20 = vadd.f32 -0.09765625, %v62_v16  ;;  %v64_v22 = vmul.f32 12.5, %v56_v18  ;;  %v441_v23 = vadd.f32 -0.09765625, %v65_v21 }
   0x6   :  { %86 = vperm.xlu1 %444, %v436_v11   ;;  %76 = vperm.xlu0 %443, %v434_v12   ;;  %v439_v19 = vadd.f32 -0.09765625, %v63_v15  ;;  %v131_v25 = vadd.f32 0.09765625, %v59_v8  ;;  %v130_v26 = vadd.f32 0.09765625, %v58_v5  ;;  %v133_v27 = vadd.f32 0.09765625, %v61_v6 }
   0x7   :  { %v440_v24 = vadd.f32 -0.09765625, %v64_v22  ;;  %v132_v28 = vadd.f32 0.09765625, %v60_v4  ;;  %v135_v29 = vadd.f32 0.09765625, %v63_v15  ;;  %v134_v30 = vadd.f32 0.09765625, %v62_v16 }
   0x8   :  { %v137_v31 = vadd.f32 0.09765625, %v65_v21  ;;  %v136_v32 = vadd.f32 0.09765625, %v64_v22  ;;  %v215_v36 = vsub.s32 0, %v214_v34  ;;  %v195_v37 = vmul.f32 12.5, %v194_v35 }
   0x9   :  { %v219_v38 = vsub.s32 1, %v214_v34 }
   0xa   :  { %91 = vperm.xlu1 %444, %v437_v13   ;;  %81 = vperm.xlu0 %443, %v435_v14   ;;  %v552_v39 = vrot.slane %v195_v37, %v215_v36 }
   0xb   :  { %v554_v41 = vrot.slane %v195_v37, %v219_v38 }
   0xe   :  { %101 = vperm.xlu1 %444, %v439_v19   ;;  %96 = vperm.xlu0 %443, %v438_v20  }
  0x12   :  { %111 = vperm.xlu1 %444, %v441_v23   ;;  %106 = vperm.xlu0 %443, %v440_v24  }
  0x16   :  { %145 = vperm.xlu1 %444, %v131_v25   ;;  %140 = vperm.xlu0 %443, %v130_v26  }
  0x1a   :  { %155 = vperm.xlu1 %444, %v133_v27   ;;  %150 = vperm.xlu0 %443, %v132_v28  }
  0x1e   :  { %165 = vperm.xlu1 %444, %v135_v29   ;;  %160 = vperm.xlu0 %443, %v134_v30  }
  0x22   :  { %175 = vperm.xlu1 %444, %v137_v31   ;;  %170 = vperm.xlu0 %443, %v136_v32  }
  0x85   :  { %v87_v40 = vpop.permute.xlu1 %86  ;;  %v77_v42 = vpop.permute.xlu0 %76 }
  0x86   :  { %v227_v43 = vsub.f32 %v552_v39, %v87_v40  ;;  %v228_v44 = vsub.f32 %v554_v41, %v87_v40  ;;  %v223_v45 = vsub.f32 %v552_v39, %v77_v42  ;;  %v224_v46 = vsub.f32 %v554_v41, %v77_v42 }
  0x88   :  { %445 = vtanh.f32 %v227_v43 }
  0x89   :  { %v92_v47 = vpop.permute.xlu1 %91  ;;  %v82_v48 = vpop.permute.xlu0 %81  ;;  %447 = vtanh.f32 %v228_v44 }
  0x8a   :  { %v229_v49 = vsub.f32 %v552_v39, %v92_v47  ;;  %v230_v50 = vsub.f32 %v554_v41, %v92_v47  ;;  %449 = vtanh.f32 %v223_v45  ;;  %v225_v51 = vsub.f32 %v552_v39, %v82_v48 }
  0x8b   :  { %451 = vtanh.f32 %v224_v46  ;;  %v226_v52 = vsub.f32 %v554_v41, %v82_v48 }
  0x8c   :  { %453 = vtanh.f32 %v229_v49 }
  0x8d   :  { %v102_v53 = vpop.permute.xlu1 %101  ;;  %v97_v54 = vpop.permute.xlu0 %96  ;;  %455 = vtanh.f32 %v230_v50 }
  0x8e   :  { %v233_v55 = vsub.f32 %v552_v39, %v102_v53  ;;  %v234_v56 = vsub.f32 %v554_v41, %v102_v53  ;;  %457 = vtanh.f32 %v225_v51  ;;  %v231_v57 = vsub.f32 %v552_v39, %v97_v54 }
  0x8f   :  { %459 = vtanh.f32 %v226_v52  ;;  %v232_v58 = vsub.f32 %v554_v41, %v97_v54 }
  0x90   :  { %461 = vtanh.f32 %v233_v55 }
  0x91   :  { %v568_v59 = vpop.permute.xlu1 %111  ;;  %v107_v60 = vpop.permute.xlu0 %106  ;;  %463 = vtanh.f32 %v234_v56 }
  0x92   :  { %v235_v61 = vsub.f32 %v552_v39, %v107_v60  ;;  %v236_v62 = vsub.f32 %v554_v41, %v107_v60  ;;  %v572_v63 = vpop.eup %445  ;;  %465 = vtanh.f32 %v231_v57  ;;  %v237_v43 = vsub.f32 %v552_v39, %v568_v59 }
  0x93   :  { %v574_v0 = vpop.eup %447  ;;  %467 = vtanh.f32 %v232_v58  ;;  %v238_v46 = vsub.f32 %v554_v41, %v568_v59 }
  0x94   :  { %v576_v3 = vpop.eup %449  ;;  %469 = vtanh.f32 %v235_v61 }
  0x95   :  { %v146_v1 = vpop.permute.xlu1 %145  ;;  %v141_v2 = vpop.permute.xlu0 %140  ;;  %471 = vtanh.f32 %v236_v62 }
  0x96   :  { %v257_v4 = vsub.f32 %v552_v39, %v146_v1  ;;  %v258_v5 = vsub.f32 %v554_v41, %v146_v1  ;;  %v255_v6 = vsub.f32 %v552_v39, %v141_v2  ;;  %v581_v7 = vpop.eup %451  ;;  %v256_v8 = vsub.f32 %v554_v41, %v141_v2 }
  0x97   :  { %v584_v9 = vpop.eup %453 }
  0x98   :  { %473 = vtanh.f32 %v257_v4  ;;  %v586_v10 = vpop.eup %455 }
  0x99   :  { %475 = vtanh.f32 %v258_v5  ;;  %v156_v11 = vpop.permute.xlu1 %155  ;;  %v151_v12 = vpop.permute.xlu0 %150 }
  0x9a   :  { %v458_v13 = vpop.eup %457  ;;  %477 = vtanh.f32 %v255_v6  ;;  %v261_v14 = vsub.f32 %v552_v39, %v156_v11  ;;  %v262_v15 = vsub.f32 %v554_v41, %v156_v11  ;;  %v259_v16 = vsub.f32 %v552_v39, %v151_v12 }
  0x9b   :  { %v460_v17 = vpop.eup %459  ;;  %479 = vtanh.f32 %v256_v8  ;;  %v260_v18 = vsub.f32 %v554_v41, %v151_v12 }
  0x9c   :  { %v592_v19 = vpop.eup %461  ;;  %481 = vtanh.f32 %v261_v14 }
  0x9d   :  { %v594_v20 = vpop.eup %463  ;;  %483 = vtanh.f32 %v262_v15  ;;  %v166_v21 = vpop.permute.xlu1 %165 }
  0x9e   :  { %v161_v22 = vpop.permute.xlu0 %160  ;;  %v466_v23 = vpop.eup %465  ;;  %485 = vtanh.f32 %v259_v16  ;;  %v265_v24 = vsub.f32 %v552_v39, %v166_v21  ;;  %v266_v25 = vsub.f32 %v554_v41, %v166_v21 }
  0x9f   :  { %v263_v26 = vsub.f32 %v552_v39, %v161_v22  ;;  %v468_v27 = vpop.eup %467  ;;  %487 = vtanh.f32 %v260_v18  ;;  %v264_v28 = vsub.f32 %v554_v41, %v161_v22 }
  0xa0   :  { %v600_v29 = vpop.eup %469  ;;  %489 = vtanh.f32 %v265_v24 }
  0xa1   :  { %v472_v30 = vpop.eup %471  ;;  %491 = vtanh.f32 %v266_v25  ;;  %v176_v31 = vpop.permute.xlu1 %175 }
  0xa2   :  { %v171_v32 = vpop.permute.xlu0 %170  ;;  %v474_v33 = vpop.eup %473  ;;  %493 = vtanh.f32 %v263_v26  ;;  %v269_v34 = vsub.f32 %v552_v39, %v176_v31  ;;  %v270_v35 = vsub.f32 %v554_v41, %v176_v31 }
  0xa3   :  { %v267_v36 = vsub.f32 %v552_v39, %v171_v32  ;;  %v476_v37 = vpop.eup %475  ;;  %495 = vtanh.f32 %v264_v28  ;;  %v268_v38 = vsub.f32 %v554_v41, %v171_v32  ;;  %v321_v40 = vsub.f32 %v458_v13, %v474_v33 }
  0xa4   :  { %v478_v42 = vpop.eup %477  ;;  %497 = vtanh.f32 %v269_v34  ;;  %v322_v44 = vsub.f32 %v460_v17, %v476_v37 }
  0xa5   :  { %v480_v45 = vpop.eup %479  ;;  %499 = vtanh.f32 %v270_v35  ;;  %v319_v47 = vsub.f32 %v576_v3, %v478_v42 }
  0xa6   :  { %v482_v48 = vpop.eup %481  ;;  %501 = vtanh.f32 %v267_v36  ;;  %v389_v49 = vadd.f32 %v322_v44, %v321_v40  ;;  %v320_v50 = vsub.f32 %v581_v7, %v480_v45 }
  0xa7   :  { %v484_v51 = vpop.eup %483  ;;  %503 = vtanh.f32 %v268_v38  ;;  %v325_v59 = vsub.f32 %v584_v9, %v482_v48 }
  0xa8   :  { %v486_v52 = vpop.eup %485  ;;  %505 = vtanh.f32 %v237_v43  ;;  %390 = vadd.xlane.f32.xlu1 %v389_v49  ;;  %v386_v39 = vadd.f32 %v320_v50, %v319_v47  ;;  %v326_v60 = vsub.f32 %v586_v10, %v484_v51 }
  0xa9   :  { %v488_v53 = vpop.eup %487  ;;  %507 = vtanh.f32 %v238_v46  ;;  %v323_v54 = vsub.f32 %v572_v63, %v486_v52 }
  0xaa   :  { %v490_v55 = vpop.eup %489  ;;  %387 = vadd.xlane.f32.xlu0 %v386_v39  ;;  %v324_v41 = vsub.f32 %v574_v0, %v488_v53  ;;  %v395_v63 = vadd.f32 %v326_v60, %v325_v59 }
  0xab   :  { %v492_v56 = vpop.eup %491  ;;  %v329_v6 = vsub.f32 %v592_v19, %v490_v55 }
  0xac   :  { %v494_v57 = vpop.eup %493  ;;  %v392_v58 = vadd.f32 %v324_v41, %v323_v54  ;;  %v330_v0 = vsub.f32 %v594_v20, %v492_v56 }
  0xad   :  { %v496_v61 = vpop.eup %495  ;;  %v327_v62 = vsub.f32 %v466_v23, %v494_v57 }
  0xae   :  { %v498_v1 = vpop.eup %497  ;;  %393 = vadd.xlane.f32.xlu0 %v392_v58  ;;  %v328_v2 = vsub.f32 %v468_v27, %v496_v61  ;;  %v401_v13 = vadd.f32 %v330_v0, %v329_v6 }
  0xaf   :  { %v500_v3 = vpop.eup %499 }
  0xb0   :  { %v502_v4 = vpop.eup %501  ;;  %v398_v5 = vadd.f32 %v328_v2, %v327_v62 }
  0xb1   :  { %v504_v7 = vpop.eup %503  ;;  %v331_v8 = vsub.f32 %v600_v29, %v502_v4 }
  0xb2   :  { %v506_v11 = vpop.eup %505  ;;  %399 = vadd.xlane.f32.xlu1 %v398_v5  ;;  %396 = vadd.xlane.f32.xlu0 %v395_v63  ;;  %v332_v9 = vsub.f32 %v472_v30, %v504_v7 }
  0xb3   :  { %v508_v10 = vpop.eup %507  ;;  %v333_v14 = vsub.f32 %v506_v11, %v498_v1 }
  0xb4   :  { %v404_v12 = vadd.f32 %v332_v9, %v331_v8  ;;  %v334_v15 = vsub.f32 %v508_v10, %v500_v3 }
  0xb6   :  { %405 = vadd.xlane.f32.xlu1 %v404_v12  ;;  %402 = vadd.xlane.f32.xlu0 %v401_v13  ;;  %v407_v16 = vadd.f32 %v334_v15, %v333_v14 }
  0xba   :  { %408 = vadd.xlane.f32.xlu0 %v407_v16 }
 0x135   :  { %v391_v17 = vpop.xlane.xlu1 %390 }
 0x136   :  { %v411_v18 = vmul.f32 0.5, %v391_v17 }
 0x137   :  { %v388_v19 = vpop.xlane.xlu0 %387 }
 0x138   :  { %420 = vst.msk [vmem:[%s653_s2 + $0x8] sm:$0xff] %vm418_vm0, %v411_v18  ;;  %v410_v20 = vmul.f32 0.5, %v388_v19 }
 0x13a   :  { %419 = vst.msk [vmem:[%s653_s2] sm:$0xff] %vm418_vm0, %v410_v20 }
 0x13b   :  { %v394_v21 = vpop.xlane.xlu0 %393 }
 0x13c   :  { %v412_v22 = vmul.f32 0.5, %v394_v21 }
 0x13e   :  { %421 = vst.msk [vmem:[%s653_s2 + $0x10] sm:$0xff] %vm418_vm0, %v412_v22 }
 0x13f   :  { %v400_v23 = vpop.xlane.xlu1 %399  ;;  %v397_v24 = vpop.xlane.xlu0 %396 }
 0x140   :  { %v414_v25 = vmul.f32 0.5, %v400_v23  ;;  %v413_v26 = vmul.f32 0.5, %v397_v24 }
 0x142   :  { %423 = vst.msk [vmem:[%s653_s2 + $0x20] sm:$0xff] %vm418_vm0, %v414_v25  ;;  %422 = vst.msk [vmem:[%s653_s2 + $0x18] sm:$0xff] %vm418_vm0, %v413_v26 }
 0x143   :  { %v406_v27 = vpop.xlane.xlu1 %405  ;;  %v403_v28 = vpop.xlane.xlu0 %402 }
 0x144   :  { %v416_v29 = vmul.f32 0.5, %v406_v27  ;;  %v415_v30 = vmul.f32 0.5, %v403_v28 }
 0x146   :  { %425 = vst.msk [vmem:[%s653_s2 + $0x30] sm:$0xff] %vm418_vm0, %v416_v29  ;;  %424 = vst.msk [vmem:[%s653_s2 + $0x28] sm:$0xff] %vm418_vm0, %v415_v30 }
 0x147   :  { %v409_v31 = vpop.xlane.xlu0 %408 }
 0x148   :  { %v417_v32 = vmul.f32 0.5, %v409_v31 }
 0x14a   :  { %426 = vst.msk [vmem:[%s653_s2 + $0x38] sm:$0xff] %vm418_vm0, %v417_v32 }

</bundles_post_ra>
